<compile_context>
chip_gen: v5e
topology: v5e:2x2
jax: 0.10.0
libtpu: 0.0.40
codegen_flags: <defaults>
</compile_context>

<pallas_src>
import warnings

import jax
import jax.numpy as jnp
from jax.experimental import pallas as pl
from jax.experimental.pallas import tpu as pltpu


_LANE = 128   # pad the tiny class dim (3) up to a full lane width


def _head_kernel(x_ref, w1_ref, b1_ref, w2_ref, b2_ref, o_ref):
    # dense: (TN, 2H) @ (2H, H) -> MXU, f32 accumulate (inputs may be bf16)
    h = jnp.dot(x_ref[...], w1_ref[...], preferred_element_type=jnp.float32)
    h = jnp.tanh(h + b1_ref[...])                        # f32 bias + tanh (EUP)
    # out_proj (lane-padded to 128 outputs): (TN, H) @ (H, 128) + (1, 128)
    out = jnp.dot(h.astype(w2_ref.dtype), w2_ref[...],
                  preferred_element_type=jnp.float32) + b2_ref[...]
    o_ref[...] = out.astype(o_ref.dtype)


def _round_up(a, m):
    return (a + m - 1) // m * m


def _choose_tn(n_rows):
    # Big tiles amortize the ~0.35 us per-grid-step overhead, but keep >= ~8
    # grid steps so the "parallel" row axis leaves each v7x TensorCore with
    # >= 4 pipelined steps after the megacore split.
    for tn in (1024, 512, 256):
        if n_rows >= 8 * tn:
            return tn
    return min(256, _round_up(max(n_rows, 1), 8))


def _vmem_limit_bytes():
    # Per-generation scoped-VMEM limit: ~75% of physical, capped at 96 MiB.
    #   v5e/v6e (128 MiB physical) -> 96 MiB;  v7x (64 MiB per core) -> 48 MiB.
    cap = None
    try:
        cap = getattr(pltpu.get_tpu_info(), "vmem_capacity_bytes", None)
    except Exception:        # hardware query unavailable (e.g. interpret mode)
        cap = None
    if not cap:
        cap = 64 * 1024 * 1024          # conservative default (v7x-sized)
    return min(cap * 3 // 4, 96 * 1024 * 1024)


def _weights_single_bufferable():
    # Construction-time probe for the pipeline_mode kwarg / pl.Buffered.
    if not hasattr(pl, "Buffered"):
        return False
    try:
        pl.BlockSpec((8, 128), lambda i: (0, 0), pipeline_mode=pl.Buffered(1))
    except (TypeError, ValueError):
        return False
    return True


def _build_call(N, TN, H, C_pad, in_dtype, out_dtype, single_buffer_weights):
    def w_spec(shape):
        if single_buffer_weights:
            # Constant index map across the grid -> one resident buffer is
            # enough; halves W1's VMEM footprint vs. the default 2 buffers.
            return pl.BlockSpec(shape, lambda i: (0, 0),
                                pipeline_mode=pl.Buffered(1))
        return pl.BlockSpec(shape, lambda i: (0, 0))

    in_bytes = jnp.dtype(in_dtype).itemsize
    out_bytes = jnp.dtype(out_dtype).itemsize
    cost = pl.CostEstimate(
        flops=N * (2 * (2 * H) * H + 2 * H * C_pad),
        transcendentals=N * H,
        bytes_accessed=(N * 2 * H * in_bytes            # X stream
                        + 2 * H * H * in_bytes          # W1
                        + H * C_pad * in_bytes          # W2 (lane-padded)
                        + (H + C_pad) * 4               # biases (f32)
                        + N * C_pad * out_bytes),       # output slab
    )

    return pl.pallas_call(
        _head_kernel,
        out_shape=jax.ShapeDtypeStruct((N, C_pad), out_dtype),
        grid=(pl.cdiv(N, TN),),                 # partial last block is masked
        in_specs=[
            pl.BlockSpec((TN, 2 * H), lambda i: (i, 0)),   # streamed, pipelined
            w_spec((2 * H, H)),                            # resident weights
            w_spec((1, H)),
            w_spec((H, C_pad)),
            w_spec((1, C_pad)),
        ],
        out_specs=pl.BlockSpec((TN, C_pad), lambda i: (i, 0)),
        compiler_params=pltpu.CompilerParams(
            # Rows are independent -> megacore sharding on v7x.
            dimension_semantics=("parallel",),
            vmem_limit_bytes=_vmem_limit_bytes(),
        ),
        cost_estimate=cost,
    )


def classification_head(x, w1, b1, w2, b2, *, compute_dtype=jnp.bfloat16):
    """Fused dense -> tanh -> out_proj (token-level ClassificationHead).

    x  : (..., H) float32
    w1 : (2H, H)  dense weight, stored (in, out)
    b1 : (1, H)   float32
    w2 : (H, 3)   out_proj weight, stored (in, out)
    b2 : (1, 3)   float32
    compute_dtype: matmul-input dtype. bf16 (default) runs the MXU at native
      rate and halves the X/W HBM + VMEM traffic; accumulation, bias add and
      tanh stay f32. Pass jnp.float32 for exact f32 numerics.
    returns (N, 3) in x.dtype, with N = x.size // (2H)
    """
    H = x.shape[-1]
    C = w2.shape[-1]
    out_dtype = x.dtype

    # reshape(-1, 2H) pairs consecutive hidden vectors (layout-only, no copy
    # pass); no wrapper-side padding of X -> no extra HBM pass over the input.
    x2 = x.reshape(-1, 2 * H).astype(compute_dtype)
    N = x2.shape[0]

    # Lane-dense output: pad the class dim to 128 (zeros) so stores are
    # unmasked full-lane vst; slice [:, :3] outside the kernel.
    C_pad = _LANE
    w2p = jnp.zeros((H, C_pad), compute_dtype).at[:, :C].set(
        w2.astype(compute_dtype))
    b2p = jnp.zeros((1, C_pad), jnp.float32).at[:, :C].set(
        b2.astype(jnp.float32))
    w1c = w1.astype(compute_dtype)
    b1c = b1.astype(jnp.float32)

    TN = _choose_tn(N)

    # TODO(synk): add a K grid axis over 2H with an f32 VMEM accumulator once
    # W1 stops fitting comfortably next to the X/h tiles (~H >= 2048 in f32 or
    # ~H >= 3072 in bf16 on v7x's 64 MiB per-core VMEM).

    single_buf = _weights_single_bufferable()
    try:
        call = _build_call(N, TN, H, C_pad, compute_dtype, out_dtype,
                           single_buffer_weights=single_buf)
        out = call(x2, w1c, b1c, w2p, b2p)
    except (TypeError, NotImplementedError) as e:
        if not single_buf:
            raise
        # Only the pipeline_mode=pl.Buffered(1) incompatibility is retried;
        # genuine lowering / VMEM errors propagate. Note: the fallback uses
        # the default double-buffered weight specs (2x W1 VMEM).
        warnings.warn(
            "classification_head: Buffered(1) weight specs rejected "
            f"({e!r}); falling back to default double-buffered weights.")
        call = _build_call(N, TN, H, C_pad, compute_dtype, out_dtype,
                           single_buffer_weights=False)
        out = call(x2, w1c, b1c, w2p, b2p)

    return out[:, :C]


def _reference(x, w1, b1, w2, b2):
    H = x.shape[-1]
    x2 = x.reshape(-1, 2 * H)
    h = jnp.tanh(x2 @ w1 + b1)
    return h @ w2 + b2


if __name__ == "__main__":
    # Small shapes consistent with the module: batch=2, seq=8, hidden=32.
    # x of shape (2, 8, 32) -> flattened to (8, 64) rows (pairs of tokens).
    B, S, H = 2, 8, 32
    key = jax.random.PRNGKey(0)
    kx, k1, kb1, k2, kb2 = jax.random.split(key, 5)

    x = jax.random.normal(kx, (B, S, H), dtype=jnp.float32)

    # Deterministic parameter init (Linear-like scaling), stored as (in, out).
    w1 = jax.random.normal(k1, (2 * H, H), dtype=jnp.float32) * (1.0 / (2 * H) ** 0.5)
    b1 = jax.random.normal(kb1, (1, H), dtype=jnp.float32) * 0.01
    w2 = jax.random.normal(k2, (H, 3), dtype=jnp.float32) * (1.0 / H ** 0.5)
    b2 = jax.random.normal(kb2, (1, 3), dtype=jnp.float32) * 0.01

    ref = _reference(x, w1, b1, w2, b2)

    # Exact-numerics path (matches the f32 PyTorch module).
    out_f32 = jax.block_until_ready(
        classification_head(x, w1, b1, w2, b2, compute_dtype=jnp.float32))
    assert out_f32.shape == (B * S // 2, 3), out_f32.shape
    assert jnp.allclose(out_f32, ref, atol=1e-5, rtol=1e-5), "f32 mismatch vs reference"

    # Default fast path: bf16 matmul inputs, f32 accumulate/bias/tanh.
    out_bf16 = jax.block_until_ready(classification_head(x, w1, b1, w2, b2))
    assert out_bf16.shape == (B * S // 2, 3), out_bf16.shape
    assert jnp.allclose(out_bf16, ref, atol=5e-2, rtol=5e-2), "bf16 mismatch vs reference"

    print("KERNEL_OK")
</pallas_src>

<mosaic_0001>
module attributes {stable_mosaic.version = 11 : i64} {
  func.func @_head_kernel(%arg0: i32, %arg1: memref<8x64xf32, #tpu.memory_space<vmem>>, %arg2: memref<64x32xf32, #tpu.memory_space<vmem>>, %arg3: memref<1x32xf32, #tpu.memory_space<vmem>>, %arg4: memref<32x128xf32, #tpu.memory_space<vmem>>, %arg5: memref<1x128xf32, #tpu.memory_space<vmem>>, %arg6: memref<8x128xf32, #tpu.memory_space<vmem>>) attributes {dimension_semantics = [#tpu.dimension_semantics<parallel>], iteration_bounds = array<i64: 1>, scalar_prefetch = 0 : i64, scratch_operands = 0 : i64, tpu.core_type = #tpu.core_type<tc>, window_params = [{transform_indices = @transform_0, window_bounds = array<i64: 8, 64>}, {pipeline_mode = #tpu.pipeline_mode<synchronous>, transform_indices = @transform_1, window_bounds = array<i64: 64, 32>}, {pipeline_mode = #tpu.pipeline_mode<synchronous>, transform_indices = @transform_2, window_bounds = array<i64: 1, 32>}, {pipeline_mode = #tpu.pipeline_mode<synchronous>, transform_indices = @transform_3, window_bounds = array<i64: 32, 128>}, {pipeline_mode = #tpu.pipeline_mode<synchronous>, transform_indices = @transform_4, window_bounds = array<i64: 1, 128>}, {transform_indices = @transform_5, window_bounds = array<i64: 8, 128>}]} {
    %c0 = arith.constant 0 : index
    %c0_0 = arith.constant 0 : index
    %0 = vector.load %arg1[%c0, %c0_0] : memref<8x64xf32, #tpu.memory_space<vmem>>, vector<8x64xf32>
    %c0_1 = arith.constant 0 : index
    %c0_2 = arith.constant 0 : index
    %1 = vector.load %arg2[%c0_1, %c0_2] : memref<64x32xf32, #tpu.memory_space<vmem>>, vector<64x32xf32>
    %cst = arith.constant dense<0.000000e+00> : vector<8x32xf32>
    %2 = tpu.matmul %0, %1, %cst {dimension_numbers = #tpu.dot_dimension_numbers<[1], [0], [0], [1], [0, 0, 1, 1], [], []>} : vector<8x64xf32>, vector<64x32xf32>, vector<8x32xf32> -> vector<8x32xf32>
    %c0_3 = arith.constant 0 : index
    %c0_4 = arith.constant 0 : index
    %3 = vector.load %arg3[%c0_3, %c0_4] : memref<1x32xf32, #tpu.memory_space<vmem>>, vector<1x32xf32>
    %4 = vector.broadcast %3 : vector<1x32xf32> to vector<8x32xf32>
    %5 = arith.addf %2, %4 : vector<8x32xf32>
    %6 = math.tanh %5 : vector<8x32xf32>
    %c0_5 = arith.constant 0 : index
    %c0_6 = arith.constant 0 : index
    %7 = vector.load %arg4[%c0_5, %c0_6] : memref<32x128xf32, #tpu.memory_space<vmem>>, vector<32x128xf32>
    %cst_7 = arith.constant dense<0.000000e+00> : vector<8x128xf32>
    %8 = tpu.matmul %6, %7, %cst_7 {dimension_numbers = #tpu.dot_dimension_numbers<[1], [0], [0], [1], [0, 0, 1, 1], [], []>} : vector<8x32xf32>, vector<32x128xf32>, vector<8x128xf32> -> vector<8x128xf32>
    %c0_8 = arith.constant 0 : index
    %c0_9 = arith.constant 0 : index
    %9 = vector.load %arg5[%c0_8, %c0_9] : memref<1x128xf32, #tpu.memory_space<vmem>>, vector<1x128xf32>
    %10 = vector.broadcast %9 : vector<1x128xf32> to vector<8x128xf32>
    %11 = arith.addf %8, %10 : vector<8x128xf32>
    %c0_10 = arith.constant 0 : index
    %c0_11 = arith.constant 0 : index
    %12 = vector.load %arg6[%c0_10, %c0_11] : memref<8x128xf32, #tpu.memory_space<vmem>>, vector<8x128xf32>
    tpu.vector_store %arg6[%c0_10, %c0_11], %11 {strides = array<i32>} : memref<8x128xf32, #tpu.memory_space<vmem>>, vector<8x128xf32>,
    return
  }
  func.func @transform_0(%arg0: i32) -> (i32, i32) {
    %c0_i32 = arith.constant 0 : i32
    %c0_i32_0 = arith.constant 0 : i32
    return %arg0, %c0_i32 : i32, i32
  }
  func.func @transform_1(%arg0: i32) -> (i32, i32) {
    %c0_i32 = arith.constant 0 : i32
    %c0_i32_0 = arith.constant 0 : i32
    %c0_i32_1 = arith.constant 0 : i32
    return %c0_i32, %c0_i32_0 : i32, i32
  }
  func.func @transform_2(%arg0: i32) -> (i32, i32) {
    %c0_i32 = arith.constant 0 : i32
    %c0_i32_0 = arith.constant 0 : i32
    %c0_i32_1 = arith.constant 0 : i32
    return %c0_i32, %c0_i32_0 : i32, i32
  }
  func.func @transform_3(%arg0: i32) -> (i32, i32) {
    %c0_i32 = arith.constant 0 : i32
    %c0_i32_0 = arith.constant 0 : i32
    %c0_i32_1 = arith.constant 0 : i32
    return %c0_i32, %c0_i32_0 : i32, i32
  }
  func.func @transform_4(%arg0: i32) -> (i32, i32) {
    %c0_i32 = arith.constant 0 : i32
    %c0_i32_0 = arith.constant 0 : i32
    %c0_i32_1 = arith.constant 0 : i32
    return %c0_i32, %c0_i32_0 : i32, i32
  }
  func.func @transform_5(%arg0: i32) -> (i32, i32) {
    %c0_i32 = arith.constant 0 : i32
    %c0_i32_0 = arith.constant 0 : i32
    return %arg0, %c0_i32 : i32, i32
  }
}

</mosaic_0001>

<bundles_post_ra>
// kernel: tpu_custom_call.1
= control target key start
LH: loop header
LB: loop body
LE: loop exit
PB: predicated region body
PF: predicated region fallthrough
CT: control target
= control target key end

     0   :  { %s220_s0 = inlined_call_operand.vmem [shape: f32[8,64], index: 0, kind: input, shape index: {}]   ;;  %s221_s1 = inlined_call_operand.vmem [shape: f32[64,32], index: 1, kind: input, shape index: {}]   ;;  %s222_s2 = inlined_call_operand.vmem [shape: f32[1,32], index: 2, kind: input, shape index: {}]   ;;  %s223_s3 = inlined_call_operand.vmem [shape: f32[32,128], index: 3, kind: input, shape index: {}]   ;;  %s224_s4 = inlined_call_operand.vmem [shape: f32[1,128], index: 4, kind: input, shape index: {}]   ;;  %s225_s5 = inlined_call_operand.hbm [shape: f32[8,128], index: 5, kind: output, shape index: {}]  }
   0x1   :  { %v29_v0 = vld [vmem:[%s221_s1 + $0x38] sm:$0xff]  ;;  %v28_v1 = vld [vmem:[%s221_s1 + $0x30] sm:$0xff]  ;;  %v27_v2 = vld [vmem:[%s221_s1 + $0x28] sm:$0xff] }
   0x2   :  { %46 = vmatpush.msra.mxu0 %v29_v0  ;;  %v26_v3 = vld [vmem:[%s221_s1 + $0x20] sm:$0xff] }
   0x4   :  { %47 = vmatpush.msra.mxu0 %v28_v1 }
   0x5   :  { %10 = vsyncpa [#allocation3], 0  ;;  %v25_v4 = vld [vmem:[%s221_s1 + $0x18] sm:$0xff]  ;;  %v24_v5 = vld [vmem:[%s221_s1 + $0x10] sm:$0xff]  ;;  %vm34_vm0 = vcmask 523264   ;;  %vm67_vm1 = vcmask 261120  }
   0x6   :  { %48 = vmatpush.msra.mxu0 %v27_v2  ;;  %v23_v6 = vld [vmem:[%s221_s1 + $0x8] sm:$0xff]  ;;  %v22_v7 = vld [vmem:[%s221_s1] sm:$0xff]  ;;  %v62_v9 = vld [vmem:[%s223_s3 + $0x18] sm:$0xff]  ;;  %s141_s21 = smov [#allocation2]   ;;  %s99_s24 = sshll.u32 %s225_s5, 4  ;;  %s100_s24 = int_to_ptr.hbm [resolvable:$true] %s99_s24 }
   0x7   :  { %v21_v8 = vld [vmem:[%s220_s0] sm:$0xff]  ;;  %83 = vmatpush.msra.mxu1 %v62_v9  ;;  %v61_v10 = vld [vmem:[%s223_s3 + $0x10] sm:$0xff]  ;;  %v60_v11 = vld [vmem:[%s223_s3 + $0x8] sm:$0xff]  ;;  %s97_s22 = sshll.u32 %s141_s21, 4  ;;  %s98_s22 = int_to_ptr.vmem [resolvable:$true] %s97_s22 }
   0x8   :  { %49 = vmatpush.msra.mxu0 %v26_v3  ;;  %v59_v12 = vld [vmem:[%s223_s3] sm:$0xff] }
   0x9   :  { %84 = vmatpush.msra.mxu1 %v61_v10  ;;  %v111_v13 = vld [vmem:[%s222_s2] ss:$0 sm:$0xff] }
   0xa   :  { %50 = vmatpush.msra.mxu0 %v25_v4  ;;  %v112_v17 = vld [vmem:[%s224_s4] ss:$0 sm:$0xff] }
   0xb   :  { %85 = vmatpush.msra.mxu1 %v60_v11 }
   0xc   :  { %51 = vmatpush.msra.mxu0 %v24_v5 }
   0xd   :  { %86 = vmatpush.msra.mxu1 %v59_v12 }
   0xe   :  { %52 = vmatpush.msra.mxu0 %v23_v6 }
  0x10   :  { %53 = vmatpush.msra.mxu0 %v22_v7 }
  0x11   :  { %108 = vmatmul.msk.f32.vlgmr.msra.gmra.mxu0 %vm34_vm0, %v21_v8 }
  0x8e   :  { %v55_v14 = vpop.f32.mrf.mxu0 }
  0x8f   :  { %v56_v15 = vadd.f32 %v111_v13, %v55_v14 }
  0x91   :  { %113 = vtanh.f32 %v56_v15 }
  0x97   :  { %v114_v16 = vpop.eup %113 }
  0x98   :  { %109 = vmatmul.msk.f32.vlgmr.msra.gmra.mxu1 %vm67_vm1, %v114_v16 }
 0x115   :  { %v88_v18 = vpop.f32.mrf.mxu1 }
 0x116   :  { %v89_v19 = vadd.f32 %v112_v17, %v88_v18 }
 0x118   :  { %91 = vst [vmem:[#allocation2] sm:$0xff] %v89_v19 }
 0x119   :  { %102 = dma.vmem_to_hbm [thread:$0]  %s98_s22, 128, %s100_s24, [#allocation3]  }
 0x11a   :  { %139 = dma.done.wait [#allocation3], 128  }
 0x11b   :  { %140 = vsyncadd [#allocation3], 4294967168 }
 0x11c   :  { %107 = vsyncpa [#allocation3], 1 }

</bundles_post_ra>
